<compile_context>
chip_gen: v5e
topology: v5e:2x2
jax: 0.10.0
libtpu: 0.0.40
codegen_flags: <defaults>
</compile_context>

<pallas_src>
import math
import functools

import jax
import jax.numpy as jnp
from jax.experimental import pallas as pl
from jax.experimental.pallas import tpu as pltpu


# ---------------------------------------------------------------------------
# Kernels
# ---------------------------------------------------------------------------

def _support_kernel(x_ref, w_ref, s_ref):
    # support = X @ W : tiny matmul, f32 accumulation, cast to streaming dtype.
    s_ref[...] = jnp.dot(x_ref[...], w_ref[...],
                         preferred_element_type=jnp.float32).astype(s_ref.dtype)


def _agg_kernel(adj_ref, sup_ref, b_ref, o_ref, *, adj_pow, k_tile, sup_resident):
    k = pl.program_id(1)

    # K_adj = adj ** pow (pow is a static Python int).  adj is streamed in f32
    # whenever pow != 1 so the power matches the f32 reference semantics.
    k_adj = adj_ref[...]
    if adj_pow != 1:
        k_adj = k_adj ** adj_pow
    k_adj = k_adj.astype(sup_ref.dtype)

    if sup_resident:
        off = pl.multiple_of(k * k_tile, k_tile)
        sup = sup_ref[pl.ds(off, k_tile), :]
    else:
        sup = sup_ref[...]

    partial = jnp.dot(k_adj, sup, preferred_element_type=jnp.float32)

    @pl.when(k == 0)
    def _first():
        o_ref[...] = partial            # no zero-fill + read-add on the first step

    @pl.when(k > 0)
    def _accumulate():
        o_ref[...] += partial

    @pl.when(k == pl.num_programs(1) - 1)
    def _epilogue():
        out = o_ref[...] + b_ref[...]
        # ELU(alpha=1); clamp expm1's argument at 0 (cheap VPU min, avoids expm1
        # of large positive activations).
        o_ref[...] = jnp.where(out > 0, out, jnp.expm1(jnp.minimum(out, 0.0)))


# ---------------------------------------------------------------------------
# Tiling helpers
# ---------------------------------------------------------------------------

def _round_up(x, m):
    return -(-x // m) * m


def _divisor_tile(n, desired, align):
    """Largest multiple of `align` that divides `n` and is <= max(desired, align).
    `n` is always a multiple of `align` here, so this always succeeds."""
    t = max(align, (min(desired, n) // align) * align)
    while t > align and n % t:
        t -= align
    return t


# ---------------------------------------------------------------------------
# Wrapper
# ---------------------------------------------------------------------------

def net_graph_convolution(x, adj, weight, bias=None, *, adj_pow=1,
                          row_tile=512, k_tile=2048,
                          matmul_dtype=jnp.bfloat16):
    N, f_in = x.shape
    f_out = weight.shape[1]
    assert adj.shape == (N, N)
    if bias is None:
        bias = jnp.zeros((f_out,), jnp.float32)

    mm_dtype = jax.dtypes.canonicalize_dtype(matmul_dtype)
    mm_item = mm_dtype.itemsize
    adj_dtype = jnp.float32 if adj_pow != 1 else mm_dtype
    adj_item = jax.dtypes.canonicalize_dtype(adj_dtype).itemsize

    # ---- generation-aware VMEM budget ------------------------------------
    try:
        vmem_cap = int(pltpu.get_tpu_info().vmem_capacity_bytes)
    except Exception:
        vmem_cap = 64 << 20                       # conservative (v7x per-TC)
    hard_cap = int(vmem_cap * 0.8)                # ~51 MiB v7x, ~102 MiB v5e/v6e

    # ---- pad N so clean, VMEM-bounded tiles always exist ------------------
    n_pad = _round_up(N, 128)
    align_m = 16 if mm_item < 4 else 8            # bf16 packs 2 rows / sublane
    tm = _divisor_tile(n_pad, row_tile, align_m)
    # v7x has two TensorCores sharing the "parallel" row axis: keep >= 2 row
    # steps when doing so keeps an MXU-filling (>=128-row), aligned tile.
    while (n_pad // tm < 2 and tm % 2 == 0 and tm // 2 >= 128
           and (tm // 2) % align_m == 0):
        tm //= 2
    tk = _divisor_tile(n_pad, k_tile, 128)

    # ---- support residency + footprint (shrink only if ever necessary) ----
    def footprint(tk_, resident):
        sup_rows = n_pad if resident else tk_
        return (2 * tm * tk_ * adj_item           # adj tiles (double buffered)
                + 2 * sup_rows * f_out * mm_item  # support block(s)
                + 2 * f_out * 4                   # bias
                + 2 * tm * f_out * 4)             # f32 output block

    resident_budget = min(12 << 20, hard_cap // 4)
    sup_resident = 2 * n_pad * f_out * mm_item <= resident_budget
    est = footprint(tk, sup_resident)
    while est > hard_cap and (sup_resident or tk > 128):
        if sup_resident:
            sup_resident = False
        else:
            tk = tk // 2 if (tk // 2) % 128 == 0 else 128   # stays a divisor
        est = footprint(tk, sup_resident)

    vmem_limit = None
    if est + (2 << 20) > (14 << 20):              # above v5e's 16 MiB scoped default
        vmem_limit = int(min(hard_cap, max(est + (8 << 20), 32 << 20)))

    # ---- prepare (padded) operands ----------------------------------------
    adj_in = adj.astype(adj_dtype)
    x_in = x.astype(jnp.float32)
    w_in = weight.astype(jnp.float32)
    bias2d = bias.reshape(1, f_out).astype(jnp.float32)
    if n_pad != N:
        pad = n_pad - N
        adj_in = jnp.pad(adj_in, ((0, pad), (0, pad)))   # zero rows/cols are inert
        x_in = jnp.pad(x_in, ((0, pad), (0, 0)))

    # ---- support = X @ W (tiny Pallas matmul, f32 accumulate) -------------
    # TODO(synk): for extremely wide layers (F_in*F_out f32 >> VMEM) W would need
    # its own tiling; not relevant at GCN-scale feature dims.
    tm_s = _divisor_tile(n_pad, 512, 8)
    support = pl.pallas_call(
        _support_kernel,
        out_shape=jax.ShapeDtypeStruct((n_pad, f_out), mm_dtype),
        grid_spec=pltpu.PrefetchScalarGridSpec(
            num_scalar_prefetch=0,
            grid=(n_pad // tm_s,),
            in_specs=[
                pl.BlockSpec((tm_s, f_in), lambda i: (i, 0)),
                pl.BlockSpec((f_in, f_out), lambda i: (0, 0)),
            ],
            out_specs=pl.BlockSpec((tm_s, f_out), lambda i: (i, 0)),
        ),
        compiler_params=pltpu.CompilerParams(
            dimension_semantics=("parallel",)),
    )(x_in, w_in)

    # ---- out = ELU(K_adj @ support + bias) ---------------------------------
    if sup_resident:
        sup_spec = pl.BlockSpec((n_pad, f_out), lambda i, k: (0, 0))   # VMEM-resident
    else:
        sup_spec = pl.BlockSpec((tk, f_out), lambda i, k: (k, 0))      # streamed slabs

    kernel = functools.partial(_agg_kernel, adj_pow=adj_pow, k_tile=tk,
                               sup_resident=sup_resident)

    out = pl.pallas_call(
        kernel,
        out_shape=jax.ShapeDtypeStruct((n_pad, f_out), jnp.float32),
        grid_spec=pltpu.PrefetchScalarGridSpec(
            num_scalar_prefetch=0,
            grid=(n_pad // tm, n_pad // tk),
            in_specs=[
                pl.BlockSpec((tm, tk), lambda i, k: (i, k)),    # adjacency tile
                sup_spec,                                       # support
                pl.BlockSpec((1, f_out), lambda i, k: (0, 0)),  # bias
            ],
            out_specs=pl.BlockSpec((tm, f_out), lambda i, k: (i, 0)),
        ),
        compiler_params=pltpu.CompilerParams(
            dimension_semantics=("parallel", "arbitrary"),
            vmem_limit_bytes=vmem_limit,
        ),
    )(adj_in, support, bias2d)

    return out[:N] if n_pad != N else out


# ---------------------------------------------------------------------------
# Reference (module semantics) and self-test
# ---------------------------------------------------------------------------

def _reference(x, adj, weight, bias, adj_pow=1):
    hp = jax.lax.Precision.HIGHEST
    k_adj = adj ** adj_pow
    support = jnp.dot(x, weight, precision=hp)
    out = jnp.dot(k_adj, support, precision=hp) + bias
    return jnp.where(out > 0, out, jnp.expm1(out))


if __name__ == "__main__":
    # Small, module-consistent shapes.
    N, in_features, out_features = 128, 64, 128

    key = jax.random.PRNGKey(0)
    k_x, k_adj, k_w, k_b = jax.random.split(key, 4)

    x = jax.random.normal(k_x, (N, in_features), dtype=jnp.float32)
    # dense "sparse" adjacency (torch.spmm on a dense tensor == dense matmul)
    adj = jax.random.uniform(k_adj, (N, N), dtype=jnp.float32)

    # reset_parameters(): uniform(-stdv, stdv), stdv = 1/sqrt(out_features)
    stdv = 1.0 / math.sqrt(out_features)
    weight = jax.random.uniform(k_w, (in_features, out_features),
                                minval=-stdv, maxval=stdv, dtype=jnp.float32)
    bias = jax.random.uniform(k_b, (out_features,),
                              minval=-stdv, maxval=stdv, dtype=jnp.float32)

    ref = _reference(x, adj, weight, bias, adj_pow=1)
    ref2 = _reference(x, adj, weight, bias, adj_pow=2)

    # 1) f32 matmul path, pow=1: tight numerical check against module semantics.
    out_f32 = jax.block_until_ready(
        net_graph_convolution(x, adj, weight, bias, adj_pow=1,
                              matmul_dtype=jnp.float32))
    assert out_f32.shape == (N, out_features)
    assert jnp.allclose(out_f32, ref, atol=3e-3, rtol=3e-3)

    # 2) pow != 1 branch, f32 path.
    out_p2 = jax.block_until_ready(
        net_graph_convolution(x, adj, weight, bias, adj_pow=2,
                              matmul_dtype=jnp.float32))
    assert jnp.allclose(out_p2, ref2, atol=3e-3, rtol=3e-3)

    # 3) default bf16 streaming path; pow=2 also checked (pow is applied to f32
    #    adjacency inside the kernel, only the matmul operands are bf16-rounded).
    out_bf = jax.block_until_ready(net_graph_convolution(x, adj, weight, bias))
    assert out_bf.shape == (N, out_features)
    assert jnp.allclose(out_bf, ref, atol=1e-1, rtol=5e-2)
    out_bf2 = jax.block_until_ready(
        net_graph_convolution(x, adj, weight, bias, adj_pow=2))
    assert jnp.allclose(out_bf2, ref2, atol=1e-1, rtol=5e-2)

    # 4) non-divisible N exercises the zero-padding path (N=100 -> padded to 128).
    Np = 100
    xp, adjp = x[:Np], adj[:Np, :Np]
    refp = _reference(xp, adjp, weight, bias, adj_pow=1)
    outp = jax.block_until_ready(
        net_graph_convolution(xp, adjp, weight, bias, adj_pow=1,
                              matmul_dtype=jnp.float32))
    assert outp.shape == (Np, out_features)
    assert jnp.allclose(outp, refp, atol=3e-3, rtol=3e-3)

    print("KERNEL_OK")
</pallas_src>

<mosaic_0001>
module attributes {stable_mosaic.version = 11 : i64} {
  func.func @_support_kernel(%arg0: i32, %arg1: memref<128x64xf32, #tpu.memory_space<vmem>>, %arg2: memref<64x128xf32, #tpu.memory_space<vmem>>, %arg3: memref<128x128xf32, #tpu.memory_space<vmem>>) attributes {dimension_semantics = [#tpu.dimension_semantics<parallel>], iteration_bounds = array<i64: 1>, scalar_prefetch = 0 : i64, scratch_operands = 0 : i64, tpu.core_type = #tpu.core_type<tc>, window_params = [{transform_indices = @transform_0, window_bounds = array<i64: 128, 64>}, {pipeline_mode = #tpu.pipeline_mode<synchronous>, transform_indices = @transform_1, window_bounds = array<i64: 64, 128>}, {transform_indices = @transform_2, window_bounds = array<i64: 128, 128>}]} {
    %c0 = arith.constant 0 : index
    %c0_0 = arith.constant 0 : index
    %0 = vector.load %arg1[%c0, %c0_0] : memref<128x64xf32, #tpu.memory_space<vmem>>, vector<128x64xf32>
    %c0_1 = arith.constant 0 : index
    %c0_2 = arith.constant 0 : index
    %1 = vector.load %arg2[%c0_1, %c0_2] : memref<64x128xf32, #tpu.memory_space<vmem>>, vector<64x128xf32>
    %cst = arith.constant dense<0.000000e+00> : vector<128x128xf32>
    %2 = tpu.matmul %0, %1, %cst {dimension_numbers = #tpu.dot_dimension_numbers<[1], [0], [0], [1], [0, 0, 1, 1], [], []>} : vector<128x64xf32>, vector<64x128xf32>, vector<128x128xf32> -> vector<128x128xf32>
    %c0_3 = arith.constant 0 : index
    %c0_4 = arith.constant 0 : index
    %3 = vector.load %arg3[%c0_3, %c0_4] : memref<128x128xf32, #tpu.memory_space<vmem>>, vector<128x128xf32>
    tpu.vector_store %arg3[%c0_3, %c0_4], %2 {strides = array<i32>} : memref<128x128xf32, #tpu.memory_space<vmem>>, vector<128x128xf32>,
    return
  }
  func.func @transform_0(%arg0: i32) -> (i32, i32) {
    %c0_i32 = arith.constant 0 : i32
    %c0_i32_0 = arith.constant 0 : i32
    return %arg0, %c0_i32 : i32, i32
  }
  func.func @transform_1(%arg0: i32) -> (i32, i32) {
    %c0_i32 = arith.constant 0 : i32
    %c0_i32_0 = arith.constant 0 : i32
    %c0_i32_1 = arith.constant 0 : i32
    return %c0_i32, %c0_i32_0 : i32, i32
  }
  func.func @transform_2(%arg0: i32) -> (i32, i32) {
    %c0_i32 = arith.constant 0 : i32
    %c0_i32_0 = arith.constant 0 : i32
    return %arg0, %c0_i32 : i32, i32
  }
}

</mosaic_0001>

<bundles_post_ra>
// kernel: tpu_custom_call.1
= control target key start
LH: loop header
LB: loop body
LE: loop exit
PB: predicated region body
PF: predicated region fallthrough
CT: control target
= control target key end

     0   :  { %s362_s0 = inlined_call_operand.vmem [shape: f32[128,64], index: 0, kind: input, shape index: {}]   ;;  %s363_s1 = inlined_call_operand.vmem [shape: f32[64,128], index: 1, kind: input, shape index: {}]   ;;  %s364_s2 = inlined_call_operand.hbm [shape: f32[128,128], index: 2, kind: output, shape index: {}]  }
   0x1   :  { %v35_v0 = vld [vmem:[%s363_s1 + $0x38] sm:$0xff]  ;;  %v34_v1 = vld [vmem:[%s363_s1 + $0x30] sm:$0xff]  ;;  %v33_v2 = vld [vmem:[%s363_s1 + $0x28] sm:$0xff] }
   0x2   :  { %201 = vmatpush.msra.mxu2 %v35_v0  ;;  %202 = vmatpush.msra.mxu3 %v35_v0  ;;  %v32_v3 = vld [vmem:[%s363_s1 + $0x20] sm:$0xff]  ;;  %v31_v4 = vld [vmem:[%s363_s1 + $0x18] sm:$0xff] }
   0x3   :  { %93 = vmatpush.msra.mxu0 %v35_v0  ;;  %200 = vmatpush.msra.mxu1 %v35_v0 }
   0x4   :  { %204 = vmatpush.msra.mxu2 %v34_v1  ;;  %205 = vmatpush.msra.mxu3 %v34_v1 }
   0x5   :  { %94 = vmatpush.msra.mxu0 %v34_v1  ;;  %203 = vmatpush.msra.mxu1 %v34_v1 }
   0x6   :  { %207 = vmatpush.msra.mxu2 %v33_v2  ;;  %208 = vmatpush.msra.mxu3 %v33_v2 }
   0x7   :  { %95 = vmatpush.msra.mxu0 %v33_v2  ;;  %206 = vmatpush.msra.mxu1 %v33_v2 }
   0x8   :  { %210 = vmatpush.msra.mxu2 %v32_v3  ;;  %211 = vmatpush.msra.mxu3 %v32_v3 }
   0x9   :  { %7 = vsyncpa [#allocation3], 0  ;;  %v30_v5 = vld [vmem:[%s363_s1 + $0x10] sm:$0xff]  ;;  %96 = vmatpush.msra.mxu0 %v32_v3  ;;  %209 = vmatpush.msra.mxu1 %v32_v3  ;;  %v29_v6 = vld [vmem:[%s363_s1 + $0x8] sm:$0xff]  ;;  %vm36_vm0 = vcmask 523264   ;;  %s254_s3 = smov 128  }
   0xa   :  { %213 = vmatpush.msra.mxu2 %v31_v4  ;;  %214 = vmatpush.msra.mxu3 %v31_v4  ;;  %v28_v7 = vld [vmem:[%s363_s1] sm:$0xff]  ;;  %v21_v12 = vld [vmem:[%s362_s0 + $0x48] sm:$0xff]  ;;  %v22_v16 = vld [vmem:[%s362_s0 + $0x50] sm:$0xff]  ;;  %s172_s1 = sshll.u32 %s364_s2, 4  ;;  %s255_s4 = smov 8   ;;  %s173_s1 = int_to_ptr.hbm [resolvable:$true] %s172_s1 }
   0xb   :  { %97 = vmatpush.msra.mxu0 %v31_v4  ;;  %212 = vmatpush.msra.mxu1 %v31_v4  ;;  %v20_v8 = vld [vmem:[%s362_s0 + $0x40] sm:$0xff]  ;;  %v25_v13 = vld [vmem:[%s362_s0 + $0x68] sm:$0xff]  ;;  %v26_v17 = vld [vmem:[%s362_s0 + $0x70] sm:$0xff] }
   0xc   :  { %216 = vmatpush.msra.mxu2 %v30_v5  ;;  %217 = vmatpush.msra.mxu3 %v30_v5  ;;  %v24_v9 = vld [vmem:[%s362_s0 + $0x60] sm:$0xff]  ;;  %v13_v14 = vld [vmem:[%s362_s0 + $0x8] sm:$0xff]  ;;  %v14_v18 = vld [vmem:[%s362_s0 + $0x10] sm:$0xff] }
   0xd   :  { %98 = vmatpush.msra.mxu0 %v30_v5  ;;  %215 = vmatpush.msra.mxu1 %v30_v5  ;;  %v12_v10 = vld [vmem:[%s362_s0] sm:$0xff]  ;;  %v17_v15 = vld [vmem:[%s362_s0 + $0x28] sm:$0xff]  ;;  %v18_v19 = vld [vmem:[%s362_s0 + $0x30] sm:$0xff] }
   0xe   :  { %219 = vmatpush.msra.mxu2 %v29_v6  ;;  %220 = vmatpush.msra.mxu3 %v29_v6  ;;  %v16_v11 = vld [vmem:[%s362_s0 + $0x20] sm:$0xff]  ;;  %v23_v20 = vld [vmem:[%s362_s0 + $0x58] sm:$0xff] }
   0xf   :  { %99 = vmatpush.msra.mxu0 %v29_v6  ;;  %218 = vmatpush.msra.mxu1 %v29_v6  ;;  %v27_v21 = vld [vmem:[%s362_s0 + $0x78] sm:$0xff] }
  0x10   :  { %222 = vmatpush.msra.mxu2 %v28_v7  ;;  %223 = vmatpush.msra.mxu3 %v28_v7  ;;  %v15_v22 = vld [vmem:[%s362_s0 + $0x18] sm:$0xff] }
  0x11   :  { %192 = vmatmul.msk.f32.vlgmr.msra.gmra.mxu2 %vm36_vm0, %v20_v8  ;;  %196 = vmatmul.msk.f32.vlgmr.msra.gmra.mxu3 %vm36_vm0, %v24_v9  ;;  %v19_v23 = vld [vmem:[%s362_s0 + $0x38] sm:$0xff]  ;;  %s253_s0 = smov [#allocation2]  }
  0x12   :  { %100 = vmatpush.msra.mxu0 %v28_v7  ;;  %221 = vmatpush.msra.mxu1 %v28_v7  ;;  %s170_s28 = sshll.u32 %s253_s0, 4  ;;  %s171_s28 = int_to_ptr.vmem [resolvable:$true] %s170_s28 }
  0x13   :  { %184 = vmatmul.msk.f32.vlgmr.msra.gmra.mxu0 %vm36_vm0, %v12_v10  ;;  %188 = vmatmul.msk.f32.vlgmr.msra.gmra.mxu1 %vm36_vm0, %v16_v11 }
  0x19   :  { %193 = vmatmul.msk.f32.gmra.mxu2 %vm36_vm0, %v21_v12  ;;  %197 = vmatmul.msk.f32.gmra.mxu3 %vm36_vm0, %v25_v13 }
  0x1b   :  { %185 = vmatmul.msk.f32.gmra.mxu0 %vm36_vm0, %v13_v14  ;;  %189 = vmatmul.msk.f32.gmra.mxu1 %vm36_vm0, %v17_v15 }
  0x21   :  { %194 = vmatmul.msk.f32.gmra.mxu2 %vm36_vm0, %v22_v16  ;;  %198 = vmatmul.msk.f32.gmra.mxu3 %vm36_vm0, %v26_v17 }
  0x23   :  { %186 = vmatmul.msk.f32.gmra.mxu0 %vm36_vm0, %v14_v18  ;;  %190 = vmatmul.msk.f32.gmra.mxu1 %vm36_vm0, %v18_v19 }
  0x29   :  { %195 = vmatmul.msk.f32.gmra.mxu2 %vm36_vm0, %v23_v20  ;;  %199 = vmatmul.msk.f32.gmra.mxu3 %vm36_vm0, %v27_v21 }
  0x2b   :  { %187 = vmatmul.msk.f32.gmra.mxu0 %vm36_vm0, %v15_v22  ;;  %191 = vmatmul.msk.f32.gmra.mxu1 %vm36_vm0, %v19_v23 }
  0x90   :  { %v102_v24 = vpop.f32.mrf.mxu0  ;;  %v114_v25 = vpop.f32.mrf.mxu1 }
  0x91   :  { %150 = vst [vmem:[#allocation2] sm:$0xff] %v102_v24 }
  0x92   :  { %154 = vst [vmem:[#allocation2 + $0x20] sm:$0xff] %v114_v25 }
  0x94   :  { %v126_v26 = vpop.f32.mrf.mxu2  ;;  %v138_v27 = vpop.f32.mrf.mxu3 }
  0x95   :  { %158 = vst [vmem:[#allocation2 + $0x40] sm:$0xff] %v126_v26 }
  0x96   :  { %162 = vst [vmem:[#allocation2 + $0x60] sm:$0xff] %v138_v27 }
  0x98   :  { %v105_v28 = vpop.f32.mrf.mxu0  ;;  %v117_v29 = vpop.f32.mrf.mxu1 }
  0x99   :  { %151 = vst [vmem:[#allocation2 + $0x8] sm:$0xff] %v105_v28 }
  0x9a   :  { %155 = vst [vmem:[#allocation2 + $0x28] sm:$0xff] %v117_v29 }
  0x9c   :  { %v129_v30 = vpop.f32.mrf.mxu2  ;;  %v141_v31 = vpop.f32.mrf.mxu3 }
  0x9d   :  { %159 = vst [vmem:[#allocation2 + $0x48] sm:$0xff] %v129_v30 }
  0x9e   :  { %163 = vst [vmem:[#allocation2 + $0x68] sm:$0xff] %v141_v31 }
  0xa0   :  { %v108_v32 = vpop.f32.mrf.mxu0  ;;  %v120_v33 = vpop.f32.mrf.mxu1 }
  0xa1   :  { %152 = vst [vmem:[#allocation2 + $0x10] sm:$0xff] %v108_v32 }
  0xa2   :  { %156 = vst [vmem:[#allocation2 + $0x30] sm:$0xff] %v120_v33 }
  0xa4   :  { %v132_v34 = vpop.f32.mrf.mxu2  ;;  %v144_v35 = vpop.f32.mrf.mxu3 }
  0xa5   :  { %160 = vst [vmem:[#allocation2 + $0x50] sm:$0xff] %v132_v34 }
  0xa6   :  { %164 = vst [vmem:[#allocation2 + $0x70] sm:$0xff] %v144_v35 }
  0xa8   :  { %v111_v36 = vpop.f32.mrf.mxu0  ;;  %v123_v37 = vpop.f32.mrf.mxu1 }
  0xa9   :  { %153 = vst [vmem:[#allocation2 + $0x18] sm:$0xff] %v111_v36 }
  0xaa   :  { %157 = vst [vmem:[#allocation2 + $0x38] sm:$0xff] %v123_v37 }
  0xac   :  { %v135_v38 = vpop.f32.mrf.mxu2  ;;  %v147_v39 = vpop.f32.mrf.mxu3 }
  0xad   :  { %161 = vst [vmem:[#allocation2 + $0x58] sm:$0xff] %v135_v38 }
  0xae   :  { %165 = vst [vmem:[#allocation2 + $0x78] sm:$0xff] %v147_v39 }
  0xaf   :  { %178 = dma.vmem_to_hbm [thread:$0]  %s171_s28, 2048, %s173_s1, [#allocation3], %s254_s3, %s254_s3, %s255_s4  }
  0xb0   :  { %251 = dma.done.wait [#allocation3], 2048  }
  0xb1   :  { %252 = vsyncadd [#allocation3], 4294965248 }
  0xb2   :  { %183 = vsyncpa [#allocation3], 1 }

</bundles_post_ra>
